<compile_context>
chip_gen: v6e
topology: v6e:2x2x1
jax: 0.10.0
libtpu: 0.0.40
codegen_flags: <defaults>
</compile_context>

<pallas_src>
import functools
import math

import jax
import jax.numpy as jnp
from jax import lax
from jax.experimental import pallas as pl
from jax.experimental.pallas import tpu as pltpu

_LANE = 128
_TARGET_TILE_BYTES = 4 * 1024 * 1024     # per streamed input, per pipeline buffer
_FEAT_FOLD_BYTES = 2 * 1024 * 1024       # fold feat Gram into epilogue below this
_VMEM_LIMIT_CAP = 48 * 1024 * 1024       # stay under v7x's 64 MiB physical per-TC
_EPS = 1e-12
_DN = (((1,), (1,)), ((), ()))           # contract last dim of both operands


def _round_up(n, m):
    return ((n + m - 1) // m) * m


def _tiling(b, d, itemsize):
    """Tile width, #tiles, 2-way core split and ragged-tail-mask flag for (b, d)."""
    d128 = _round_up(max(d, 1), _LANE)
    cap = max(_LANE, (_TARGET_TILE_BYTES // max(1, b * itemsize)) // _LANE * _LANE)
    tk = min(d128, cap)
    n_k = pl.cdiv(d, tk)
    nsplit = 2 if n_k >= 2 else 1          # v7x: one half of D per TensorCore
    n_half = pl.cdiv(n_k, nsplit)
    need_mask = (nsplit * n_half * tk) != d
    return tk, n_k, nsplit, n_half, need_mask


def _vmem_limit_bytes(n_stream_inputs, b, tk, itemsize):
    # 2 pipeline buffers per streamed input + f32 mask/cast temporaries + slack.
    need = n_stream_inputs * b * tk * (2 * itemsize + 4) + (4 << 20)
    return int(min(max(need, 16 << 20), _VMEM_LIMIT_CAP))


def _mask_cols(x, start, d_total):
    """Zero the lanes of a (b, tk) tile that fall past the true feature dim."""
    lane = lax.broadcasted_iota(jnp.int32, x.shape, 1)
    return jnp.where(lane < (d_total - start), x, jnp.zeros_like(x))


# ----------------------------------------------------------------------------
# Streaming kernels: grid = (nsplit cores "parallel", k tiles of D "arbitrary").
# Output blocks (1,B,B)/(1,B,1) per core stay resident across k (accumulators).
# ----------------------------------------------------------------------------
def _gram_kernel(x_ref, g_ref, *, tk, d_total, n_half, need_mask):
    c = pl.program_id(0)
    k = pl.program_id(1)

    @pl.when(k == 0)
    def _():
        g_ref[...] = jnp.zeros_like(g_ref)

    x = x_ref[...]
    if need_mask:
        start = (c * n_half + k) * tk
        x = _mask_cols(x, start, d_total)
    g_ref[...] += lax.dot_general(
        x, x, dimension_numbers=_DN, preferred_element_type=jnp.float32)[None]


def _pair_kernel(a_ref, b_ref, gaa_ref, gbb_ref, gab_ref,
                 *, tk, d_total, n_half, need_mask):
    c = pl.program_id(0)
    k = pl.program_id(1)

    @pl.when(k == 0)
    def _():
        gaa_ref[...] = jnp.zeros_like(gaa_ref)
        gbb_ref[...] = jnp.zeros_like(gbb_ref)
        gab_ref[...] = jnp.zeros_like(gab_ref)

    a = a_ref[...]
    b = b_ref[...]
    if need_mask:
        start = (c * n_half + k) * tk
        a = _mask_cols(a, start, d_total)
        b = _mask_cols(b, start, d_total)
    gaa_ref[...] += lax.dot_general(
        a, a, dimension_numbers=_DN, preferred_element_type=jnp.float32)[None]
    gbb_ref[...] += lax.dot_general(
        b, b, dimension_numbers=_DN, preferred_element_type=jnp.float32)[None]
    gab_ref[...] += lax.dot_general(
        a, b, dimension_numbers=_DN, preferred_element_type=jnp.float32)[None]


def _rowdiff_kernel(a_ref, b_ref, rd_ref, *, tk, d_total, n_half, need_mask):
    c = pl.program_id(0)
    k = pl.program_id(1)

    @pl.when(k == 0)
    def _():
        rd_ref[...] = jnp.zeros_like(rd_ref)

    d = a_ref[...].astype(jnp.float32) - b_ref[...].astype(jnp.float32)
    if need_mask:
        start = (c * n_half + k) * tk
        d = _mask_cols(d, start, d_total)
    rd_ref[...] += jnp.sum(d * d, axis=1, keepdims=True)[None]


# ----------------------------------------------------------------------------
# Streaming wrappers.
# ----------------------------------------------------------------------------
def _gram(x):
    """Gram of flattened x: (B, ...) -> (B, B) f32  (= flat(x) @ flat(x).T)."""
    b = x.shape[0]
    d = max(1, math.prod(x.shape[1:]))
    x2 = x.reshape(b, d)
    itemsize = x2.dtype.itemsize
    tk, n_k, nsplit, n_half, need_mask = _tiling(b, d, itemsize)
    n_last = n_k - 1
    in_map = lambda c, k: (0, jnp.minimum(c * n_half + k, n_last))
    out_map = lambda c, k: (c, 0, 0)
    kern = functools.partial(_gram_kernel, tk=tk, d_total=d, n_half=n_half,
                             need_mask=need_mask)
    part = pl.pallas_call(
        kern,
        out_shape=jax.ShapeDtypeStruct((nsplit, b, b), jnp.float32),
        grid_spec=pltpu.PrefetchScalarGridSpec(
            num_scalar_prefetch=0,
            grid=(nsplit, n_half),
            in_specs=[pl.BlockSpec((b, tk), in_map)],
            out_specs=pl.BlockSpec((1, b, b), out_map),
        ),
        compiler_params=pltpu.CompilerParams(
            dimension_semantics=("parallel", "arbitrary"),
            vmem_limit_bytes=_vmem_limit_bytes(1, b, tk, itemsize)),
        cost_estimate=pl.CostEstimate(
            flops=2 * b * b * d, transcendentals=0,
            bytes_accessed=b * d * itemsize + nsplit * b * b * 4),
    )(x2)
    return jnp.sum(part, axis=0)


def _pair_grams(fm1, fm2):
    """Same-shape pair, one HBM pass: (Gram(fm1), Gram(fm2), CrossGram(fm1,fm2))."""
    b = fm1.shape[0]
    d = max(1, math.prod(fm1.shape[1:]))
    a2 = fm1.reshape(b, d)
    b2 = fm2.reshape(b, d)
    itemsize = max(a2.dtype.itemsize, b2.dtype.itemsize)
    tk, n_k, nsplit, n_half, need_mask = _tiling(b, d, itemsize)
    n_last = n_k - 1
    in_map = lambda c, k: (0, jnp.minimum(c * n_half + k, n_last))
    out_map = lambda c, k: (c, 0, 0)
    kern = functools.partial(_pair_kernel, tk=tk, d_total=d, n_half=n_half,
                             need_mask=need_mask)
    gaa_p, gbb_p, gab_p = pl.pallas_call(
        kern,
        out_shape=(jax.ShapeDtypeStruct((nsplit, b, b), jnp.float32),
                   jax.ShapeDtypeStruct((nsplit, b, b), jnp.float32),
                   jax.ShapeDtypeStruct((nsplit, b, b), jnp.float32)),
        grid_spec=pltpu.PrefetchScalarGridSpec(
            num_scalar_prefetch=0,
            grid=(nsplit, n_half),
            in_specs=[pl.BlockSpec((b, tk), in_map),
                      pl.BlockSpec((b, tk), in_map)],
            out_specs=(pl.BlockSpec((1, b, b), out_map),
                       pl.BlockSpec((1, b, b), out_map),
                       pl.BlockSpec((1, b, b), out_map)),
        ),
        compiler_params=pltpu.CompilerParams(
            dimension_semantics=("parallel", "arbitrary"),
            vmem_limit_bytes=_vmem_limit_bytes(2, b, tk, itemsize)),
        cost_estimate=pl.CostEstimate(
            flops=6 * b * b * d, transcendentals=0,
            bytes_accessed=2 * b * d * itemsize + 3 * nsplit * b * b * 4),
    )(a2, b2)
    return jnp.sum(gaa_p, axis=0), jnp.sum(gbb_p, axis=0), jnp.sum(gab_p, axis=0)


def _rowdiff(a, b):
    """Row-wise sum of squared differences of two equal-shape (B, D) maps -> (B,)."""
    bb = a.shape[0]
    d = a.shape[1]
    itemsize = max(a.dtype.itemsize, b.dtype.itemsize)
    tk, n_k, nsplit, n_half, need_mask = _tiling(bb, d, itemsize)
    n_last = n_k - 1
    in_map = lambda c, k: (0, jnp.minimum(c * n_half + k, n_last))
    out_map = lambda c, k: (c, 0, 0)
    kern = functools.partial(_rowdiff_kernel, tk=tk, d_total=d, n_half=n_half,
                             need_mask=need_mask)
    part = pl.pallas_call(
        kern,
        out_shape=jax.ShapeDtypeStruct((nsplit, bb, 1), jnp.float32),
        grid_spec=pltpu.PrefetchScalarGridSpec(
            num_scalar_prefetch=0,
            grid=(nsplit, n_half),
            in_specs=[pl.BlockSpec((bb, tk), in_map),
                      pl.BlockSpec((bb, tk), in_map)],
            out_specs=pl.BlockSpec((1, bb, 1), out_map),
        ),
        compiler_params=pltpu.CompilerParams(
            dimension_semantics=("parallel", "arbitrary"),
            vmem_limit_bytes=_vmem_limit_bytes(2, bb, tk, itemsize)),
        cost_estimate=pl.CostEstimate(
            flops=3 * bb * d, transcendentals=0,
            bytes_accessed=2 * bb * d * itemsize + nsplit * bb * 4),
    )(a, b)
    return jnp.sum(part, axis=0)[:, 0]


# ----------------------------------------------------------------------------
# Tiny epilogue kernel: feat Grams + normalized distance graphs + MSEs + weights.
# ----------------------------------------------------------------------------
def _combine_kernel(out_s_ref, out_t_ref,
                    fs_ref, ft_ref,
                    g_s1_ref, g_t1_ref,
                    g_s2_ref, g_t2_ref,
                    trs_ref, trt_ref,
                    loss_ref, *, w_vert, w_edge, w_tran, feat_is_raw):
    def mse(a, b):
        d = a - b
        return jnp.sum(d * d) / float(d.size)

    def gram_of(f):
        f = f.astype(jnp.float32)
        return lax.dot_general(f, f, dimension_numbers=_DN,
                               preferred_element_type=jnp.float32)

    def edge(g):
        n = g.shape[0]
        rows = lax.broadcasted_iota(jnp.int32, (n, n), 0)
        cols = lax.broadcasted_iota(jnp.int32, (n, n), 1)
        eye = rows == cols
        gd = jnp.where(eye, g, 0.0)
        sq_col = jnp.sum(gd, axis=1, keepdims=True)   # (n, 1): ||x_i||^2
        sq_row = jnp.sum(gd, axis=0, keepdims=True)   # (1, n): ||x_j||^2
        dist = jnp.maximum(sq_row + sq_col - 2.0 * g, _EPS)
        dist = jnp.where(eye, 0.0, dist)               # zero diagonal
        return dist / jnp.max(dist, keepdims=True)

    def tran(t):
        t = jnp.maximum(t, _EPS)
        return t / jnp.max(t, keepdims=True)

    if feat_is_raw:
        g_feat_s = gram_of(fs_ref[...])
        g_feat_t = gram_of(ft_ref[...])
    else:
        g_feat_s = fs_ref[...]
        g_feat_t = ft_ref[...]

    loss_vert = mse(out_s_ref[...].astype(jnp.float32),
                    out_t_ref[...].astype(jnp.float32))
    loss_edge = (mse(edge(g_feat_s), edge(g_feat_t))
                 + mse(edge(g_s1_ref[...]), edge(g_t1_ref[...]))
                 + mse(edge(g_s2_ref[...]), edge(g_t2_ref[...]))) / 3.0
    loss_tran = mse(tran(trs_ref[...]), tran(trt_ref[...]))

    loss_ref[0, 0] = (w_vert * loss_vert + w_edge * loss_edge
                      + w_tran * loss_tran)


# ----------------------------------------------------------------------------
# Module-level wrapper (forward pass of IRG).
# ----------------------------------------------------------------------------
def _tran_preprocess(fm1, fm2):
    """Mirror of IRG.euclidean_dist_fms preprocessing."""
    b, c1, h1, w1 = fm1.shape
    _, c2, h2, w2 = fm2.shape
    if h1 > h2:
        # adaptive_avg_pool2d to fm2's spatial size (exact-multiple case).
        # TODO(synk): general (non-divisible) adaptive average pooling not implemented.
        assert h1 % h2 == 0 and w1 % w2 == 0, "adaptive pool needs exact multiples"
        fm1 = fm1.reshape(b, c1, h2, h1 // h2, w2, w1 // w2).mean(axis=(3, 5))
    if c1 < c2:
        fm2 = (fm2[:, 0::2, :, :] + fm2[:, 1::2, :, :]) / 2.0
    return fm1, fm2


def _pair_stats(fm1, fm2):
    """(Gram(flat fm1), Gram(flat fm2), tran row sq-distance (1,B))."""
    if fm1.shape == fm2.shape:
        # One HBM pass: both Grams plus the cross Gram; row distance from diags.
        gaa, gbb, gab = _pair_grams(fm1, fm2)
        tran = (jnp.diagonal(gaa) + jnp.diagonal(gbb) - 2.0 * jnp.diagonal(gab))
        return gaa, gbb, tran.reshape(1, -1)
    # Mismatched shapes: separate Gram streams; tran on the (smaller) pooled /
    # channel-averaged tensors produced by XLA.
    # TODO(synk): fusing the pooled row-diff into the Gram stream would save one
    # extra HBM read of the larger feature map.
    g1 = _gram(fm1)
    g2 = _gram(fm2)
    p1, p2 = _tran_preprocess(fm1, fm2)
    f1 = p1.reshape(p1.shape[0], -1)
    f2 = p2.reshape(p2.shape[0], -1)
    assert f1.shape == f2.shape, "tran pair must match after preprocessing"
    rd = _rowdiff(f1, f2)
    return g1, g2, rd.reshape(1, -1)


def irg_loss(irg_s, irg_t, w_irg_vert=0.1, w_irg_edge=5.0, w_irg_tran=5.0):
    fm_s1, fm_s2, feat_s, out_s = irg_s
    fm_t1, fm_t2, feat_t, out_t = irg_t
    b = out_s.shape[0]

    g_fm_s1, g_fm_s2, tran_s = _pair_stats(fm_s1, fm_s2)
    g_fm_t1, g_fm_t2, tran_t = _pair_stats(fm_t1, fm_t2)

    feat_s2 = feat_s.reshape(b, -1)
    feat_t2 = feat_t.reshape(b, -1)
    feat_is_raw = (
        feat_s2.size * feat_s2.dtype.itemsize <= _FEAT_FOLD_BYTES
        and feat_t2.size * feat_t2.dtype.itemsize <= _FEAT_FOLD_BYTES)
    if feat_is_raw:
        fs_in, ft_in = feat_s2, feat_t2        # Grams computed inside epilogue
    else:
        fs_in, ft_in = _gram(feat_s2), _gram(feat_t2)

    out_s2 = out_s.reshape(b, -1)
    out_t2 = out_t.reshape(b, -1)

    kernel = functools.partial(_combine_kernel,
                               w_vert=float(w_irg_vert),
                               w_edge=float(w_irg_edge),
                               w_tran=float(w_irg_tran),
                               feat_is_raw=feat_is_raw)
    loss = pl.pallas_call(
        kernel,
        out_shape=jax.ShapeDtypeStruct((1, 1), jnp.float32),
        in_specs=[pl.BlockSpec(memory_space=pltpu.MemorySpace.VMEM)] * 10,
        out_specs=pl.BlockSpec(memory_space=pltpu.MemorySpace.SMEM),
    )(out_s2, out_t2, fs_in, ft_in,
      g_fm_s1, g_fm_t1, g_fm_s2, g_fm_t2, tran_s, tran_t)
    return loss[0, 0]


# ----------------------------------------------------------------------------
# Pure-JAX reference (for the sanity check).
# ----------------------------------------------------------------------------
def _irg_ref(irg_s, irg_t, w_vert, w_edge, w_tran):
    fm_s1, fm_s2, feat_s, out_s = irg_s
    fm_t1, fm_t2, feat_t, out_t = irg_t

    def mse(a, b):
        return jnp.mean((a.astype(jnp.float32) - b.astype(jnp.float32)) ** 2)

    def edge(x):
        x = x.reshape(x.shape[0], -1).astype(jnp.float32)
        sq = jnp.sum(x * x, axis=1)
        g = x @ x.T
        d = jnp.maximum(sq[None, :] + sq[:, None] - 2.0 * g, _EPS)
        d = d * (1.0 - jnp.eye(x.shape[0], dtype=d.dtype))
        return d / jnp.max(d)

    def tran(fm1, fm2):
        p1, p2 = _tran_preprocess(fm1, fm2)
        f1 = p1.reshape(p1.shape[0], -1).astype(jnp.float32)
        f2 = p2.reshape(p2.shape[0], -1).astype(jnp.float32)
        d = jnp.maximum(jnp.sum((f1 - f2) ** 2, axis=-1), _EPS)
        return d / jnp.max(d)

    loss_vert = mse(out_s, out_t)
    loss_edge = (mse(edge(feat_s), edge(feat_t))
                 + mse(edge(fm_s1), edge(fm_t1))
                 + mse(edge(fm_s2), edge(fm_t2))) / 3.0
    loss_tran = mse(tran(fm_s1, fm_s2), tran(fm_t1, fm_t2))
    return w_vert * loss_vert + w_edge * loss_edge + w_tran * loss_tran


if __name__ == "__main__":
    key = jax.random.PRNGKey(0)
    ks = jax.random.split(key, 8)

    B = 8
    # Student branch: matching feature-map shapes, ragged D=300 -> exercises the
    # fused 3-Gram pair kernel with the in-kernel tail mask.
    fm_s1 = jax.random.normal(ks[0], (B, 3, 10, 10), dtype=jnp.float32)
    fm_s2 = jax.random.normal(ks[1], (B, 3, 10, 10), dtype=jnp.float32)
    feat_s = jax.random.normal(ks[2], (B, 32), dtype=jnp.float32)
    out_s = jax.random.normal(ks[3], (B, 10), dtype=jnp.float32)
    # Teacher branch: mismatched shapes -> pooling / channel-averaging tran path.
    fm_t1 = jax.random.normal(ks[4], (B, 8, 16, 16), dtype=jnp.float32)
    fm_t2 = jax.random.normal(ks[5], (B, 16, 8, 8), dtype=jnp.float32)
    feat_t = jax.random.normal(ks[6], (B, 64), dtype=jnp.float32)
    out_t = jax.random.normal(ks[7], (B, 10), dtype=jnp.float32)

    w_vert, w_edge, w_tran = 0.1, 5.0, 5.0
    irg_s = (fm_s1, fm_s2, feat_s, out_s)
    irg_t = (fm_t1, fm_t2, feat_t, out_t)

    ref = jax.block_until_ready(_irg_ref(irg_s, irg_t, w_vert, w_edge, w_tran))

    def _check(tag):
        loss = jax.block_until_ready(
            irg_loss(irg_s, irg_t, w_vert, w_edge, w_tran))
        assert jnp.isfinite(loss), f"{tag}: loss is not finite"
        rel = abs(float(loss) - float(ref)) / max(1e-6, abs(float(ref)))
        assert rel < 1e-4, (tag, float(loss), float(ref))

    # 1) Production tile sizes (single-tile per stream at these small shapes).
    _check("default-tiles")

    # 2) Tiny tiles to exercise the multi-tile reduction, the 2-way
    #    ("parallel") TensorCore split, index-map clamping and tail masking.
    _TARGET_TILE_BYTES = 24 * 1024
    _check("small-tiles")

    print("KERNEL_OK")
</pallas_src>

<mosaic_0001>
module attributes {stable_mosaic.version = 11 : i64} {
  func.func @_pair_kernel(%arg0: i32, %arg1: i32, %arg2: memref<8x384xf32, #tpu.memory_space<vmem>>, %arg3: memref<8x384xf32, #tpu.memory_space<vmem>>, %arg4: memref<1x8x8xf32, #tpu.memory_space<vmem>>, %arg5: memref<1x8x8xf32, #tpu.memory_space<vmem>>, %arg6: memref<1x8x8xf32, #tpu.memory_space<vmem>>) attributes {dimension_semantics = [#tpu.dimension_semantics<parallel>, #tpu.dimension_semantics<arbitrary>], iteration_bounds = array<i64: 1, 1>, scalar_prefetch = 0 : i64, scratch_operands = 0 : i64, tpu.core_type = #tpu.core_type<tc>, window_params = [{transform_indices = @transform_0, window_bounds = array<i64: 8, 384>}, {transform_indices = @transform_1, window_bounds = array<i64: 8, 384>}, {transform_indices = @transform_2, window_bounds = array<i64: 1, 8, 8>}, {transform_indices = @transform_3, window_bounds = array<i64: 1, 8, 8>}, {transform_indices = @transform_4, window_bounds = array<i64: 1, 8, 8>}]} {
    %c0_i32 = arith.constant 0 : i32
    %0 = arith.cmpi eq, %arg1, %c0_i32 : i32
    %1 = arith.extui %0 : i1 to i32
    %c0_i32_0 = arith.constant 0 : i32
    %2 = arith.cmpi ne, %1, %c0_i32_0 : i32
    scf.if %2 {
      %cst_27 = arith.constant 0.000000e+00 : f32
      %35 = vector.broadcast %cst_27 : f32 to vector<1x8x8xf32>
      %c0_28 = arith.constant 0 : index
      %c0_29 = arith.constant 0 : index
      %c0_30 = arith.constant 0 : index
      %36 = vector.load %arg4[%c0_28, %c0_29, %c0_30] : memref<1x8x8xf32, #tpu.memory_space<vmem>>, vector<1x8x8xf32>
      tpu.vector_store %arg4[%c0_28, %c0_29, %c0_30], %35 {strides = array<i32>} : memref<1x8x8xf32, #tpu.memory_space<vmem>>, vector<1x8x8xf32>,
      %cst_31 = arith.constant 0.000000e+00 : f32
      %37 = vector.broadcast %cst_31 : f32 to vector<1x8x8xf32>
      %c0_32 = arith.constant 0 : index
      %c0_33 = arith.constant 0 : index
      %c0_34 = arith.constant 0 : index
      %38 = vector.load %arg5[%c0_32, %c0_33, %c0_34] : memref<1x8x8xf32, #tpu.memory_space<vmem>>, vector<1x8x8xf32>
      tpu.vector_store %arg5[%c0_32, %c0_33, %c0_34], %37 {strides = array<i32>} : memref<1x8x8xf32, #tpu.memory_space<vmem>>, vector<1x8x8xf32>,
      %cst_35 = arith.constant 0.000000e+00 : f32
      %39 = vector.broadcast %cst_35 : f32 to vector<1x8x8xf32>
      %c0_36 = arith.constant 0 : index
      %c0_37 = arith.constant 0 : index
      %c0_38 = arith.constant 0 : index
      %40 = vector.load %arg6[%c0_36, %c0_37, %c0_38] : memref<1x8x8xf32, #tpu.memory_space<vmem>>, vector<1x8x8xf32>
      tpu.vector_store %arg6[%c0_36, %c0_37, %c0_38], %39 {strides = array<i32>} : memref<1x8x8xf32, #tpu.memory_space<vmem>>, vector<1x8x8xf32>,
    } else {
    }
    %c0 = arith.constant 0 : index
    %c0_1 = arith.constant 0 : index
    %3 = vector.load %arg2[%c0, %c0_1] : memref<8x384xf32, #tpu.memory_space<vmem>>, vector<8x384xf32>
    %c0_2 = arith.constant 0 : index
    %c0_3 = arith.constant 0 : index
    %4 = vector.load %arg3[%c0_2, %c0_3] : memref<8x384xf32, #tpu.memory_space<vmem>>, vector<8x384xf32>
    %c1_i32 = arith.constant 1 : i32
    %5 = arith.muli %arg0, %c1_i32 : i32
    %6 = arith.addi %5, %arg1 : i32
    %c384_i32 = arith.constant 384 : i32
    %7 = arith.muli %6, %c384_i32 : i32
    %8 = tpu.iota {dimensions = array<i32: 1>} : vector<8x384xi32>
    %c300_i32 = arith.constant 300 : i32
    %9 = arith.subi %c300_i32, %7 : i32
    %10 = vector.broadcast %9 : i32 to vector<8x384xi32>
    %11 = arith.cmpi slt, %8, %10 : vector<8x384xi32>
    %cst = arith.constant 0.000000e+00 : f32
    %12 = vector.broadcast %cst : f32 to vector<8x384xf32>
    %13 = arith.select %11, %3, %12 : vector<8x384xi1>, vector<8x384xf32>
    %14 = tpu.iota {dimensions = array<i32: 1>} : vector<8x384xi32>
    %c300_i32_4 = arith.constant 300 : i32
    %15 = arith.subi %c300_i32_4, %7 : i32
    %16 = vector.broadcast %15 : i32 to vector<8x384xi32>
    %17 = arith.cmpi slt, %14, %16 : vector<8x384xi32>
    %cst_5 = arith.constant 0.000000e+00 : f32
    %18 = vector.broadcast %cst_5 : f32 to vector<8x384xf32>
    %19 = arith.select %17, %4, %18 : vector<8x384xi1>, vector<8x384xf32>
    %c0_6 = arith.constant 0 : index
    %c0_7 = arith.constant 0 : index
    %c0_8 = arith.constant 0 : index
    %20 = vector.load %arg4[%c0_6, %c0_7, %c0_8] : memref<1x8x8xf32, #tpu.memory_space<vmem>>, vector<1x8x8xf32>
    %cst_9 = arith.constant dense<0.000000e+00> : vector<8x8xf32>
    %21 = tpu.matmul %13, %13, %cst_9 {dimension_numbers = #tpu.dot_dimension_numbers<[1], [1], [0], [0], [0, 0, 1, 0], [], []>} : vector<8x384xf32>, vector<8x384xf32>, vector<8x8xf32> -> vector<8x8xf32>
    %22 = vector.shape_cast %21 : vector<8x8xf32> to vector<1x8x8xf32>
    %23 = arith.addf %20, %22 : vector<1x8x8xf32>
    %c0_10 = arith.constant 0 : index
    %c0_11 = arith.constant 0 : index
    %c0_12 = arith.constant 0 : index
    %24 = vector.load %arg4[%c0_10, %c0_11, %c0_12] : memref<1x8x8xf32, #tpu.memory_space<vmem>>, vector<1x8x8xf32>
    tpu.vector_store %arg4[%c0_10, %c0_11, %c0_12], %23 {strides = array<i32>} : memref<1x8x8xf32, #tpu.memory_space<vmem>>, vector<1x8x8xf32>,
    %c0_13 = arith.constant 0 : index
    %c0_14 = arith.constant 0 : index
    %c0_15 = arith.constant 0 : index
    %25 = vector.load %arg5[%c0_13, %c0_14, %c0_15] : memref<1x8x8xf32, #tpu.memory_space<vmem>>, vector<1x8x8xf32>
    %cst_16 = arith.constant dense<0.000000e+00> : vector<8x8xf32>
    %26 = tpu.matmul %19, %19, %cst_16 {dimension_numbers = #tpu.dot_dimension_numbers<[1], [1], [0], [0], [0, 0, 1, 0], [], []>} : vector<8x384xf32>, vector<8x384xf32>, vector<8x8xf32> -> vector<8x8xf32>
    %27 = vector.shape_cast %26 : vector<8x8xf32> to vector<1x8x8xf32>
    %28 = arith.addf %25, %27 : vector<1x8x8xf32>
    %c0_17 = arith.constant 0 : index
    %c0_18 = arith.constant 0 : index
    %c0_19 = arith.constant 0 : index
    %29 = vector.load %arg5[%c0_17, %c0_18, %c0_19] : memref<1x8x8xf32, #tpu.memory_space<vmem>>, vector<1x8x8xf32>
    tpu.vector_store %arg5[%c0_17, %c0_18, %c0_19], %28 {strides = array<i32>} : memref<1x8x8xf32, #tpu.memory_space<vmem>>, vector<1x8x8xf32>,
    %c0_20 = arith.constant 0 : index
    %c0_21 = arith.constant 0 : index
    %c0_22 = arith.constant 0 : index
    %30 = vector.load %arg6[%c0_20, %c0_21, %c0_22] : memref<1x8x8xf32, #tpu.memory_space<vmem>>, vector<1x8x8xf32>
    %cst_23 = arith.constant dense<0.000000e+00> : vector<8x8xf32>
    %31 = tpu.matmul %13, %19, %cst_23 {dimension_numbers = #tpu.dot_dimension_numbers<[1], [1], [0], [0], [0, 0, 1, 0], [], []>} : vector<8x384xf32>, vector<8x384xf32>, vector<8x8xf32> -> vector<8x8xf32>
    %32 = vector.shape_cast %31 : vector<8x8xf32> to vector<1x8x8xf32>
    %33 = arith.addf %30, %32 : vector<1x8x8xf32>
    %c0_24 = arith.constant 0 : index
    %c0_25 = arith.constant 0 : index
    %c0_26 = arith.constant 0 : index
    %34 = vector.load %arg6[%c0_24, %c0_25, %c0_26] : memref<1x8x8xf32, #tpu.memory_space<vmem>>, vector<1x8x8xf32>
    tpu.vector_store %arg6[%c0_24, %c0_25, %c0_26], %33 {strides = array<i32>} : memref<1x8x8xf32, #tpu.memory_space<vmem>>, vector<1x8x8xf32>,
    return
  }
  func.func @transform_0(%arg0: i32, %arg1: i32) -> (i32, i32) {
    %c1_i32 = arith.constant 1 : i32
    %0 = arith.muli %arg0, %c1_i32 : i32
    %1 = arith.addi %0, %arg1 : i32
    %c0_i32 = arith.constant 0 : i32
    %2 = arith.minsi %1, %c0_i32 : i32
    %c0_i32_0 = arith.constant 0 : i32
    %c0_i32_1 = arith.constant 0 : i32
    return %c0_i32_0, %2 : i32, i32
  }
  func.func @transform_1(%arg0: i32, %arg1: i32) -> (i32, i32) {
    %c1_i32 = arith.constant 1 : i32
    %0 = arith.muli %arg0, %c1_i32 : i32
    %1 = arith.addi %0, %arg1 : i32
    %c0_i32 = arith.constant 0 : i32
    %2 = arith.minsi %1, %c0_i32 : i32
    %c0_i32_0 = arith.constant 0 : i32
    %c0_i32_1 = arith.constant 0 : i32
    return %c0_i32_0, %2 : i32, i32
  }
  func.func @transform_2(%arg0: i32, %arg1: i32) -> (i32, i32, i32) {
    %c0_i32 = arith.constant 0 : i32
    %c0_i32_0 = arith.constant 0 : i32
    %c0_i32_1 = arith.constant 0 : i32
    return %arg0, %c0_i32, %c0_i32_0 : i32, i32, i32
  }
  func.func @transform_3(%arg0: i32, %arg1: i32) -> (i32, i32, i32) {
    %c0_i32 = arith.constant 0 : i32
    %c0_i32_0 = arith.constant 0 : i32
    %c0_i32_1 = arith.constant 0 : i32
    return %arg0, %c0_i32, %c0_i32_0 : i32, i32, i32
  }
  func.func @transform_4(%arg0: i32, %arg1: i32) -> (i32, i32, i32) {
    %c0_i32 = arith.constant 0 : i32
    %c0_i32_0 = arith.constant 0 : i32
    %c0_i32_1 = arith.constant 0 : i32
    return %arg0, %c0_i32, %c0_i32_0 : i32, i32, i32
  }
}

</mosaic_0001>

<bundles_post_ra>
// kernel: tpu_custom_call.1
= control target key start
LH: loop header
LB: loop body
LE: loop exit
PB: predicated region body
PF: predicated region fallthrough
CT: control target
= control target key end

     0   :  { %10 = vsyncpa [#allocation3], 0  ;;  %s772_s0 = inlined_call_operand.hbm [shape: f32[8,300], index: 0, kind: input, shape index: {}]   ;;  %s773_s1 = inlined_call_operand.hbm [shape: f32[8,300], index: 1, kind: input, shape index: {}]   ;;  %s774_s2 = inlined_call_operand.hbm [shape: f32[1,8,8], index: 2, kind: output, shape index: {0}]   ;;  %s775_s3 = inlined_call_operand.hbm [shape: f32[1,8,8], index: 3, kind: output, shape index: {1}]   ;;  %s776_s4 = inlined_call_operand.hbm [shape: f32[1,8,8], index: 4, kind: output, shape index: {2}]  }
   0x1   :  { %11 = vsyncpa [#allocation6], 0 }
   0x2   :  { %12 = vsyncpa [#allocation4], 0 }
   0x3   :  { %13 = vsyncpa [#allocation9], 0  ;;  %s710_s15 = smov [#allocation2]   ;;  %s711_s17 = smov [#allocation5]  }
   0x4   :  { %s26_s16 = sshll.u32 %s710_s15, 4  ;;  %s42_s18 = sshll.u32 %s711_s17, 4  ;;  %s27_s16 = int_to_ptr.vmem [resolvable:$true] %s26_s16  ;;  %s43_s18 = int_to_ptr.vmem [resolvable:$true] %s42_s18 }
   0x5   :  { %s610_s19 = scalar_lea.vmem %s27_s16, 384  ;;  %p615_p1 = scmp.lt.s32.totalorder %s27_s16, %s27_s16 }
   0x6   :  { %p611_p0 = scmp.ne.s32.totalorder %s27_s16, %s610_s19  ;;  %p616_p2 = scmp.lt.s32.totalorder %s610_s19, %s610_s19 }
   0x8   :  { %p617_p3 = por %p616_p2, %p615_p1 }
   0xa   :  { %p618_p4 = pnand %p617_p3, %p611_p0 }
   0xc   :  { %621 = shalt.err (!%p618_p4)
}
   0xd   :  { %29 = dma.hbm_to_vmem [thread:$0]  %s772_s0, 384, %s27_s16, [#allocation3]  }
   0xe   :  { %s630_s22 = scalar_lea.vmem %s43_s18, 384  ;;  %p635_p6 = scmp.lt.s32.totalorder %s43_s18, %s43_s18 }
   0xf   :  { %p631_p5 = scmp.ne.s32.totalorder %s43_s18, %s630_s22  ;;  %p636_p7 = scmp.lt.s32.totalorder %s630_s22, %s630_s22 }
  0x11   :  { %p637_p8 = por %p636_p7, %p635_p6 }
  0x13   :  { %p638_p9 = pnand %p637_p8, %p631_p5 }
  0x15   :  { %641 = shalt.err (!%p638_p9)
}
  0x16   :  { %45 = dma.hbm_to_vmem [thread:$0]  %s773_s1, 384, %s43_s18, [#allocation6]  }
  0x17   :  { %702 = dma.done.wait [#allocation3], 384  }
  0x18   :  { %703 = vsyncadd [#allocation3], 4294966912 }
  0x19   :  { %704 = dma.done.wait [#allocation6], 384  }
  0x1a   :  { %705 = vsyncadd [#allocation6], 4294966912  ;;  %v76_v0 = vlaneseq  ;;  %v712_v1 = vmov 0.0   ;;  %vm713_vm0 = vmmov 0   ;;  %v69_v4 = vld [vmem:[#allocation2 + $0x8] sm:$0xff]  ;;  %v70_v5 = vld [vmem:[#allocation2 + $0x10] sm:$0xff] }
  0x1b   :  { %580 = vmatprep.subr.mxu1 %v712_v1  ;;  %582 = vmatprep.mubr.msk.f32.mxu1 %vm713_vm0, %v712_v1  ;;  %v68_v6 = vld [vmem:[#allocation2] sm:$0xff]  ;;  %v73_v8 = vld [vmem:[#allocation5 + $0x10] sm:$0xff]  ;;  %v71_v9 = vld [vmem:[#allocation5] sm:$0xff]  ;;  %vm64_vm2 = vcmask 64512   ;;  %s714_s0 = smov [#allocation7]   ;;  %s715_s25 = smov [#allocation8]  }
  0x1c   :  { %v77_v2 = vand.u32 127, %v76_v0  ;;  %122 = vmatprep.subr.mxu0 %v69_v4  ;;  %v72_v7 = vld [vmem:[#allocation5 + $0x8] sm:$0xff]  ;;  %156 = vmatprep.mubr.f32.mxu0 %v69_v4  ;;  %65 = vst.msk [vmem:[#allocation7] sm:$0xff] %vm64_vm2, %v712_v1  ;;  %66 = vst.msk [vmem:[#allocation8] sm:$0xff] %vm64_vm2, %v712_v1  ;;  %s527_s1 = sshll.u32 %s714_s0, 4  ;;  %s537_s26 = sshll.u32 %s715_s25, 4  ;;  %s528_s1 = int_to_ptr.vmem [resolvable:$true] %s527_s1  ;;  %s538_s26 = int_to_ptr.vmem [resolvable:$true] %s537_s26 }
  0x1d   :  { %123 = vmatpush1.xpose.msra.mxu0 %v68_v6  ;;  %67 = vst.msk [vmem:[#allocation10] sm:$0xff] %vm64_vm2, %v712_v1  ;;  %s642_s27 = scalar_lea.vmem %s528_s1, 128  ;;  %p647_p11 = scmp.lt.s32.totalorder %s528_s1, %s528_s1 }
  0x1e   :  { %v79_v3 = vadd.s32 256, %v77_v2  ;;  %266 = vmatprep.subr.mxu0 %v72_v7  ;;  %p643_p10 = scmp.ne.s32.totalorder %s528_s1, %s642_s27  ;;  %p648_p12 = scmp.lt.s32.totalorder %s642_s27, %s642_s27 }
  0x20   :  { %vm84_vm1 = vcmp.lt.s32.totalorder %v79_v3, 300  ;;  %157 = vmatmul.mubr.f32.vlgmr.msra.gmra.mxu0 %v68_v6  ;;  %p649_p13 = por %p648_p12, %p647_p11 }
  0x21   :  { %581 = vmatpush3.xpose.msk.msra.mxu1 %vm84_vm1, %v70_v5  ;;  %267 = vmatpush1.xpose.msra.mxu0 %v71_v9 }
  0x22   :  { %585 = vmatprep.subr.mxu1 %v712_v1  ;;  %300 = vmatprep.mubr.f32.mxu0 %v72_v7  ;;  %p650_p0 = pnand %p649_p13, %p643_p10 }
  0x23   :  { %409 = vmatprep.subr.mxu0 %v72_v7  ;;  %v91_v11 = vld [vmem:[#allocation7] sm:$0xff]  ;;  %v235_v18 = vld [vmem:[#allocation8] sm:$0xff] }
  0x24   :  { %583 = vmatmul.mubr.msk.f32.vlgmr.msra.gmra.mxu1 %vm84_vm1, %v70_v5  ;;  %301 = vmatmul.mubr.f32.vlgmr.msra.gmra.mxu0 %v71_v9 }
  0x25   :  { %586 = vmatpush3.xpose.msk.msra.mxu1 %vm84_vm1, %v73_v8  ;;  %587 = vmatprep.mubr.msk.f32.mxu1 %vm713_vm0, %v712_v1 }
  0x26   :  { %590 = vmatprep.subr.mxu1 %v712_v1  ;;  %410 = vmatpush1.xpose.msra.mxu0 %v71_v9 }
  0x27   :  { %443 = vmatprep.mubr.f32.mxu0 %v69_v4 }
  0x28   :  { %588 = vmatmul.mubr.msk.f32.vlgmr.msra.gmra.mxu1 %vm84_vm1, %v73_v8 }
  0x29   :  { %591 = vmatpush3.xpose.msk.msra.mxu1 %vm84_vm1, %v73_v8  ;;  %592 = vmatprep.mubr.msk.f32.mxu1 %vm713_vm0, %v712_v1 }
  0x2a   :  { %444 = vmatmul.mubr.f32.vlgmr.msra.gmra.mxu0 %v68_v6 }
  0x2c   :  { %593 = vmatmul.mubr.msk.f32.vlgmr.msra.gmra.mxu1 %vm84_vm1, %v70_v5 }
  0xe0   :  { %v158_v12 = vpop.f32.mrf.mxu0 }
  0xe2   :  { %v160_v15 = vpop.f32.mrf.mxu0 }
  0xe4   :  { %v228_v10 = vpop.f32.mrf.mxu1  ;;  %v302_v19 = vpop.f32.mrf.mxu0 }
  0xe5   :  { %v229_v13 = vadd.f32 %v228_v10, %v158_v12 }
  0xe6   :  { %v584_v14 = vpop.f32.mrf.mxu1  ;;  %v304_v22 = vpop.f32.mrf.mxu0 }
  0xe7   :  { %v232_v16 = vadd.f32 %v229_v13, %v91_v11 }
  0xe8   :  { %v372_v17 = vpop.f32.mrf.mxu1 }
  0xe9   :  { %234 = vst.msk [vmem:[#allocation7] sm:$0xff] %vm64_vm2, %v232_v16  ;;  %v373_v20 = vadd.f32 %v372_v17, %v302_v19 }
  0xea   :  { %v589_v21 = vpop.f32.mrf.mxu1 }
  0xeb   :  { %653 = shalt.err (!%p650_p0)
}
  0xec   :  { %530 = dma.vmem_to_hbm [thread:$0]  %s528_s1, 128, %s774_s2, [#allocation4]   ;;  %v376_v23 = vadd.f32 %v373_v20, %v235_v18  ;;  %v515_v24 = vpop.f32.mrf.mxu1  ;;  %v378_v25 = vld [vmem:[#allocation10] sm:$0xff]  ;;  %v445_v26 = vpop.f32.mrf.mxu0 }
  0xed   :  { %s716_s30 = smov [#allocation10]   ;;  %v516_v27 = vadd.f32 %v515_v24, %v445_v26  ;;  %s662_s6 = scalar_lea.vmem %s538_s26, 128 }
  0xee   :  { %s547_s5 = sshll.u32 %s716_s30, 4  ;;  %377 = vst.msk [vmem:[#allocation8] sm:$0xff] %vm64_vm2, %v376_v23  ;;  %v594_v28 = vpop.f32.mrf.mxu1  ;;  %v447_v29 = vpop.f32.mrf.mxu0  ;;  %p663_p1 = scmp.ne.s32.totalorder %s538_s26, %s662_s6  ;;  %s548_s5 = int_to_ptr.vmem [resolvable:$true] %s547_s5 }
  0xef   :  { %p667_p2 = scmp.lt.s32.totalorder %s538_s26, %s538_s26  ;;  %p668_p3 = scmp.lt.s32.totalorder %s662_s6, %s662_s6 }
  0xf1   :  { %p669_p4 = por %p668_p3, %p667_p2 }
  0xf3   :  { %p670_p5 = pnand %p669_p4, %p663_p1 }
  0xf5   :  { %673 = shalt.err (!%p670_p5)
}
  0xf6   :  { %540 = dma.vmem_to_hbm [thread:$0]  %s538_s26, 128, %s775_s3, [#allocation9]   ;;  %v519_v30 = vadd.f32 %v516_v27, %v378_v25 }
  0xf7   :  { %s682_s8 = scalar_lea.vmem %s548_s5, 128  ;;  %p687_p7 = scmp.lt.s32.totalorder %s548_s5, %s548_s5 }
  0xf8   :  { %520 = vst.msk [vmem:[#allocation10] sm:$0xff] %vm64_vm2, %v519_v30  ;;  %p683_p6 = scmp.ne.s32.totalorder %s548_s5, %s682_s8  ;;  %p688_p8 = scmp.lt.s32.totalorder %s682_s8, %s682_s8 }
  0xfa   :  { %p689_p9 = por %p688_p8, %p687_p7 }
  0xfc   :  { %p690_p10 = pnand %p689_p9, %p683_p6 }
  0xfe   :  { %693 = shalt.err (!%p690_p10)
}
  0xff   :  { %550 = dma.vmem_to_hbm [thread:$0]  %s548_s5, 128, %s776_s4, [#allocation9]  }
 0x100   :  { %706 = dma.done.wait [#allocation4], 128  }
 0x101   :  { %707 = vsyncadd [#allocation4], 4294967168 }
 0x102   :  { %708 = dma.done.wait [#allocation9], 256  }
 0x103   :  { %709 = vsyncadd [#allocation9], 4294967040 }
 0x104   :  { %560 = vsyncpa [#allocation3], 1 }
 0x105   :  { %561 = vsyncpa [#allocation6], 1 }
 0x106   :  { %562 = vsyncpa [#allocation4], 1 }
 0x107   :  { %563 = vsyncpa [#allocation9], 1 }

</bundles_post_ra>
